<compile_context>
chip_gen: v7x
topology: tpu7x:2x2x1
jax: 0.10.0
libtpu: 0.0.40
codegen_flags: <defaults>
</compile_context>

<pallas_src>
import jax
import jax.numpy as jnp
from jax.experimental import pallas as pl
from jax.experimental.pallas import tpu as pltpu


# ---------------------------------------------------------------------------
# Pallas kernel: out = relu( sum_s A[s] @ V3[s] ), tiled, f32 accumulator
# ---------------------------------------------------------------------------
def _rgc_matmul_relu_kernel(a_ref, v_ref, o_ref, acc_ref):
    s = pl.program_id(2)
    k = pl.program_id(3)

    @pl.when((s == 0) & (k == 0))
    def _():
        acc_ref[...] = jnp.zeros_like(acc_ref)

    acc_ref[...] += jnp.dot(
        a_ref[...], v_ref[...], preferred_element_type=jnp.float32
    )

    @pl.when((s == pl.num_programs(2) - 1) & (k == pl.num_programs(3) - 1))
    def _():
        # ReLU on the f32 accumulator, then cast to the output dtype.
        o_ref[...] = jnp.maximum(acc_ref[...], 0.0).astype(o_ref.dtype)


def _round_up(x, m):
    return ((x + m - 1) // m) * m


def _pick_tile(dim, pref, align):
    # Smallest align-multiple covering `dim`, capped at `pref`.
    return min(pref, _round_up(dim, align))


def rgc_matmul_relu(A, V3, *, tm=256, tn=256, tk=512, compute_dtype=jnp.bfloat16):
    """out = relu(concat_s(A[s]) @ V) without materializing the concatenation.

    A:  (support, N, input_dim)
    V3: (support, input_dim, h_dim)  -- V3[s, j] == V[s*input_dim + j]
    Returns (N, h_dim) float32.
    """
    S, N, K = A.shape
    S2, K2, H = V3.shape
    assert S == S2 and K == K2

    # Tile sizes: multiples of (8,128)-friendly 128, clamped so tiny problems
    # collapse to a minimal grid.
    tm = _pick_tile(N, tm, 128)
    tn = _pick_tile(H, tn, 128)
    tk = _pick_tile(K, tk, 128)

    Mp, Kp, Hp = _round_up(N, tm), _round_up(K, tk), _round_up(H, tn)

    if (Mp, Kp) != (N, K):
        A = jnp.pad(A, ((0, 0), (0, Mp - N), (0, Kp - K)))
    if (Kp, Hp) != (K, H):
        V3 = jnp.pad(V3, ((0, 0), (0, Kp - K), (0, Hp - H)))

    A_p = A.astype(compute_dtype)
    V_p = V3.astype(compute_dtype)

    grid = (Mp // tm, Hp // tn, S, Kp // tk)

    itemsize = jnp.dtype(compute_dtype).itemsize
    cost = pl.CostEstimate(
        flops=int(2 * Mp * Hp * S * Kp),
        transcendentals=0,
        bytes_accessed=int(A_p.size * itemsize + V_p.size * itemsize + Mp * Hp * 4),
    )

    out = pl.pallas_call(
        _rgc_matmul_relu_kernel,
        out_shape=jax.ShapeDtypeStruct((Mp, Hp), jnp.float32),
        grid_spec=pltpu.PrefetchScalarGridSpec(
            num_scalar_prefetch=0,
            grid=grid,
            in_specs=[
                # A tile: support axis squeezed, (tm, tk) window.
                pl.BlockSpec((pl.Squeezed(), tm, tk), lambda i, j, s, k: (s, i, k)),
                # V tile for the same support: (tk, tn) window.
                pl.BlockSpec((pl.Squeezed(), tk, tn), lambda i, j, s, k: (s, k, j)),
            ],
            out_specs=pl.BlockSpec((tm, tn), lambda i, j, s, k: (i, j)),
            scratch_shapes=[pltpu.VMEM((tm, tn), jnp.float32)],
        ),
        compiler_params=pltpu.CompilerParams(
            dimension_semantics=("parallel", "parallel", "arbitrary", "arbitrary"),
        ),
        cost_estimate=cost,
    )(A_p, V_p)

    return out[:N, :H]


# ---------------------------------------------------------------------------
# Parameter setup / glue (plain JAX)
# ---------------------------------------------------------------------------
def xavier_uniform(key, shape, dtype=jnp.float32):
    fan_in, fan_out = shape[0], shape[1]
    bound = jnp.sqrt(6.0 / (fan_in + fan_out))
    return jax.random.uniform(key, shape, dtype, minval=-bound, maxval=bound)


def compute_V(W, W_comp, *, input_dim, num_bases, h_dim, support):
    # W: (input_dim*num_bases, h_dim), W_comp: (support, num_bases)
    Wr = W.reshape(num_bases, input_dim, h_dim).transpose(1, 0, 2)  # (in, nb, h)
    V = jnp.einsum("sb,ibh->ish", W_comp, Wr)                       # (in, support, h)
    # torch.reshape row-major flatten of (input_dim, support, h) -> (support*input_dim, h)
    return V.reshape(support * input_dim, h_dim)


def rgc_network_forward(features, A, W, W_comp, *, input_dim, h_dim, support, num_bases):
    """Featureless RGCN layer forward (eval mode). `features` unused (featureless=True)."""
    del features
    V = compute_V(W, W_comp, input_dim=input_dim, num_bases=num_bases,
                  h_dim=h_dim, support=support)
    # Row s*input_dim + j of V is exactly V3[s, j] after this (row-major) reshape,
    # matching the column layout of the (never materialized) concatenated `supports`.
    V3 = V.reshape(support, input_dim, h_dim)
    # featureless "ones * dropout" scaling and the network-level dropout are identity in eval mode.
    return rgc_matmul_relu(A, V3)


# ---------------------------------------------------------------------------
# Main
# ---------------------------------------------------------------------------
if __name__ == "__main__":
    # Small, tile-friendly shapes consistent with the module.
    num_nodes = 128        # featureless RGCN: adjacency is (N, input_dim) with input_dim == N
    input_dim = 128
    hidden_dim = 128
    support = 2
    num_bases = 2
    drop_prob = 0.5        # identity in eval mode

    key = jax.random.PRNGKey(0)
    k_a, k_w, k_wc, k_f = jax.random.split(key, 4)

    # Dense stand-ins for the sparse adjacency matrices (sparse-ish random graphs).
    dense = jax.random.uniform(k_a, (support, num_nodes, input_dim), jnp.float32)
    A = jnp.where(dense > 0.9, dense, 0.0)  # ~10% nonzeros, like a sparse adjacency

    # Unused (featureless=True), kept for interface parity with inputs[0].
    features = jax.random.normal(k_f, (num_nodes, input_dim), jnp.float32)

    # Deterministic xavier_uniform parameters (same shapes as the PyTorch module).
    W = xavier_uniform(k_w, (input_dim * num_bases, hidden_dim))
    W_comp = xavier_uniform(k_wc, (support, num_bases))

    out = rgc_network_forward(
        features, A, W, W_comp,
        input_dim=input_dim, h_dim=hidden_dim, support=support, num_bases=num_bases,
    )
    out = jax.block_until_ready(out)
    assert out.shape == (num_nodes, hidden_dim)

    # --- Reference checks ---
    supports_ref = jnp.concatenate([A[s] for s in range(support)], axis=1)
    V_ref = compute_V(W, W_comp, input_dim=input_dim, num_bases=num_bases,
                      h_dim=hidden_dim, support=support)

    # (a) dtype-matched reference (bf16 inputs, f32 accumulation) -> tight tolerance.
    ref_bf16 = jnp.maximum(
        jnp.dot(supports_ref.astype(jnp.bfloat16), V_ref.astype(jnp.bfloat16),
                preferred_element_type=jnp.float32), 0.0)
    assert jnp.allclose(out, ref_bf16, atol=1e-4, rtol=1e-4)

    # (b) full-f32 reference (original torch semantics) -> loose tolerance for the
    #     bf16 input quantization.
    ref_f32 = jnp.maximum(supports_ref @ V_ref, 0.0)
    assert jnp.allclose(out, ref_f32, atol=2e-2, rtol=2e-2)

    print("KERNEL_OK")
</pallas_src>

<mosaic_0001>
module attributes {stable_mosaic.version = 11 : i64} {
  func.func @_rgc_matmul_relu_kernel(%arg0: i32, %arg1: i32, %arg2: i32, %arg3: i32, %arg4: memref<1x128x128xbf16, #tpu.memory_space<vmem>>, %arg5: memref<1x128x128xbf16, #tpu.memory_space<vmem>>, %arg6: memref<128x128xf32, #tpu.memory_space<vmem>>, %arg7: memref<128x128xf32, #tpu.memory_space<vmem>>) attributes {dimension_semantics = [#tpu.dimension_semantics<parallel>, #tpu.dimension_semantics<parallel>, #tpu.dimension_semantics<arbitrary>, #tpu.dimension_semantics<arbitrary>], iteration_bounds = array<i64: 1, 1, 2, 1>, scalar_prefetch = 0 : i64, scratch_operands = 1 : i64, tpu.core_type = #tpu.core_type<tc>, window_params = [{transform_indices = @transform_0, window_bounds = array<i64: 1, 128, 128>}, {transform_indices = @transform_1, window_bounds = array<i64: 1, 128, 128>}, {transform_indices = @transform_2, window_bounds = array<i64: 128, 128>}]} {
    %c0_i32 = arith.constant 0 : i32
    %0 = arith.cmpi eq, %arg2, %c0_i32 : i32
    %c0_i32_0 = arith.constant 0 : i32
    %1 = arith.cmpi eq, %arg3, %c0_i32_0 : i32
    %2 = arith.andi %0, %1 : i1
    %3 = arith.extui %2 : i1 to i32
    %c0_i32_1 = arith.constant 0 : i32
    %4 = arith.cmpi ne, %3, %c0_i32_1 : i32
    scf.if %4 {
      %cst_13 = arith.constant 0.000000e+00 : f32
      %18 = vector.broadcast %cst_13 : f32 to vector<128x128xf32>
      %c0_14 = arith.constant 0 : index
      %c0_15 = arith.constant 0 : index
      %19 = vector.load %arg7[%c0_14, %c0_15] : memref<128x128xf32, #tpu.memory_space<vmem>>, vector<128x128xf32>
      tpu.vector_store %arg7[%c0_14, %c0_15], %18 {strides = array<i32>} : memref<128x128xf32, #tpu.memory_space<vmem>>, vector<128x128xf32>,
    } else {
    }
    %c0 = arith.constant 0 : index
    %c0_2 = arith.constant 0 : index
    %5 = vector.load %arg7[%c0, %c0_2] : memref<128x128xf32, #tpu.memory_space<vmem>>, vector<128x128xf32>
    %c0_3 = arith.constant 0 : index
    %c0_4 = arith.constant 0 : index
    %c0_5 = arith.constant 0 : index
    %6 = vector.load %arg4[%c0_3, %c0_4, %c0_5] : memref<1x128x128xbf16, #tpu.memory_space<vmem>>, vector<1x128x128xbf16>
    %7 = vector.shape_cast %6 : vector<1x128x128xbf16> to vector<128x128xbf16>
    %c0_6 = arith.constant 0 : index
    %c0_7 = arith.constant 0 : index
    %c0_8 = arith.constant 0 : index
    %8 = vector.load %arg5[%c0_6, %c0_7, %c0_8] : memref<1x128x128xbf16, #tpu.memory_space<vmem>>, vector<1x128x128xbf16>
    %9 = vector.shape_cast %8 : vector<1x128x128xbf16> to vector<128x128xbf16>
    %cst = arith.constant dense<0.000000e+00> : vector<128x128xf32>
    %10 = tpu.matmul %7, %9, %cst {dimension_numbers = #tpu.dot_dimension_numbers<[1], [0], [0], [1], [0, 0, 1, 1], [], []>} : vector<128x128xbf16>, vector<128x128xbf16>, vector<128x128xf32> -> vector<128x128xf32>
    %11 = arith.addf %5, %10 : vector<128x128xf32>
    %c0_9 = arith.constant 0 : index
    %c0_10 = arith.constant 0 : index
    %12 = vector.load %arg7[%c0_9, %c0_10] : memref<128x128xf32, #tpu.memory_space<vmem>>, vector<128x128xf32>
    tpu.vector_store %arg7[%c0_9, %c0_10], %11 {strides = array<i32>} : memref<128x128xf32, #tpu.memory_space<vmem>>, vector<128x128xf32>,
    %c1_i32 = arith.constant 1 : i32
    %13 = arith.cmpi eq, %arg2, %c1_i32 : i32
    %c0_i32_11 = arith.constant 0 : i32
    %14 = arith.cmpi eq, %arg3, %c0_i32_11 : i32
    %15 = arith.andi %13, %14 : i1
    %16 = arith.extui %15 : i1 to i32
    %c0_i32_12 = arith.constant 0 : i32
    %17 = arith.cmpi ne, %16, %c0_i32_12 : i32
    scf.if %17 {
      %c0_13 = arith.constant 0 : index
      %c0_14 = arith.constant 0 : index
      %18 = vector.load %arg7[%c0_13, %c0_14] : memref<128x128xf32, #tpu.memory_space<vmem>>, vector<128x128xf32>
      %cst_15 = arith.constant 0.000000e+00 : f32
      %19 = vector.broadcast %cst_15 : f32 to vector<128x128xf32>
      %20 = arith.maximumf %18, %19 : vector<128x128xf32>
      %c0_16 = arith.constant 0 : index
      %c0_17 = arith.constant 0 : index
      %21 = vector.load %arg6[%c0_16, %c0_17] : memref<128x128xf32, #tpu.memory_space<vmem>>, vector<128x128xf32>
      tpu.vector_store %arg6[%c0_16, %c0_17], %20 {strides = array<i32>} : memref<128x128xf32, #tpu.memory_space<vmem>>, vector<128x128xf32>,
    } else {
    }
    return
  }
  func.func @transform_0(%arg0: i32, %arg1: i32, %arg2: i32, %arg3: i32) -> (i32, i32, i32) {
    %c0_i32 = arith.constant 0 : i32
    return %arg2, %arg0, %arg3 : i32, i32, i32
  }
  func.func @transform_1(%arg0: i32, %arg1: i32, %arg2: i32, %arg3: i32) -> (i32, i32, i32) {
    %c0_i32 = arith.constant 0 : i32
    return %arg2, %arg3, %arg1 : i32, i32, i32
  }
  func.func @transform_2(%arg0: i32, %arg1: i32, %arg2: i32, %arg3: i32) -> (i32, i32) {
    %c0_i32 = arith.constant 0 : i32
    return %arg0, %arg1 : i32, i32
  }
}

</mosaic_0001>

<bundles_post_ra>
// kernel: tpu_custom_call.1
= control target key start
LH: loop header
LB: loop body
LE: loop exit
PB: predicated region body
PF: predicated region fallthrough
CT: control target
= control target key end

     0   :  { %7 = vsyncpa [#allocation4], 0  ;;  %s1294_s0 = inlined_call_operand.hbm [shape: bf16[2,128,128], index: 0, kind: input, shape index: {}]   ;;  %s1295_s1 = inlined_call_operand.hbm [shape: bf16[2,128,128], index: 1, kind: input, shape index: {}]   ;;  %s1296_s2 = inlined_call_operand.hbm [shape: f32[128,128], index: 2, kind: output, shape index: {}]  }
   0x1   :  { %9 = vsyncpa [#allocation4 + $0x1], 0 }
   0x2   :  { %10 = vsyncpa [#allocation7], 0 }
   0x3   :  { %12 = vsyncpa [#allocation7 + $0x1], 0 }
   0x4   :  { %13 = vsyncpa [#allocation5], 0  ;;  %s1061_s9 = smov 0   ;;  %s1063_s10 = smov 0  }
   0x5   :  { %s1065_s11 = smov 0   ;;  %s1067_s12 = smov 0  }
   0x6   :  { %s1069_s13 = smov 0   ;;  %s1071_s14 = smov 0  }
   0x7 LB: > { %s702_s15 = sadd.s32 4294967295, %s1036_s14   ;;  %s37_s16 = sadd.s32 1, %s1032_s13  ;;  %s1036_s14 = sphi %s1071_s14, %s19_s14   ;;  %s1032_s13 = sphi %s1069_s13, %s1308_s13   ;;  %s1028_s12 = sphi %s1067_s12, %s1307_s12   ;;  %s1024_s11 = sphi %s1065_s11, %s1306_s11   ;;  %s1020_s10 = sphi %s1063_s10, %s1305_s10   ;;  %s1016_s9 = sphi %s1061_s9, %s1304_s9  }
   0x8   : > { %p39_p0 = scmp.ge.s32.totalorder %s37_s16, 2  ;;  %s56_s17 = sadd.s32 1, %s1024_s11 }
   0x9   : > { %p63_p1 = scmp.ne.s32.totalorder %s1024_s11, %s1020_s10  ;;  %p64_p2 = scmp.eq.s32.totalorder %s1036_s14, 0 }
   0xa   : > { %s1310_s16 = smov (%p39_p0, %s37_s16), 0  ;;  %p69_p4 = scmp.ne.s32.totalorder %s1020_s10, %s1016_s9 }
   0xb   : > { %p1097_p3 = por %p64_p2, %p63_p1  ;;  %s49_s19 = ssub.s32 %s1032_s13, %s1310_s16 }
   0xc   : > { %p70_p5 = scmp.eq.s32.totalorder %s702_s15, 0  ;;  %p54_p6 = scmp.eq.s32.totalorder %s49_s19, 0 }
   0xd   : > { %p819_p8 = scmp.lt.s32.totalorder %s1036_s14, 2  ;;  %s1115_s22 = sand.u32 1, %s1024_s11  }
   0xe   : > { %p1106_p7 = por %p70_p5, %p69_p4  ;;  %s736_s23 = sshll.u32 %s1032_s13, 10 }
   0xf   : > { %s1112_s21 = scalar_select %p54_p6, %s1024_s11, %s56_s17  }
  0x10   : > { %s1299_s20 = scalar_select %p1106_p7, 1, 0 }
  0x11   : > { %s705_s24 = sshll.u32 %s1115_s22, 6  ;;  %s1124_s27 = scalar_lea.hbm %s1294_s0, %s736_s23 }
  0x12   : > { %s155_s28 = scalar_lea.vmem [#allocation3], %s705_s24  ;;  %p1130_p9 = pnand %p819_p8, %p1097_p3 }
  0x13   : > { %s165_s29 = sshll.u32 %s155_s28, 4  ;;  %s152_s3 = scalar_lea.sflag [#allocation4], %s1115_s22  ;;  %s1134_s29 = int_to_ptr.vmem [resolvable:$true] %s165_s29 }
  0x14   : > { %s892_s4 = scalar_lea.hbm %s1124_s27, 1024  ;;  %p894_p11 = pneg %p1130_p9 }
  0x15   : > { %p893_p10 = scmp.ne.s32.totalorder %s1124_s27, %s892_s4  ;;  %s897_s7 = scalar_lea.hbm %s1294_s0, 2048 }
  0x16   : > { %p898_p0 = scmp.lt.u32.totalorder %s1124_s27, %s1294_s0  ;;  %p899_p1 = scmp.lt.u32.totalorder %s897_s7, %s892_s4 }
  0x17   : > { %p895_p12 = pnand %p894_p11, %p893_p10  ;;  %p901_p3 = scmp.lt.u32.totalorder %s892_s4, %s1124_s27 }
  0x18   : > { %p900_p2 = por %p899_p1, %p898_p0 }
  0x19   : > { %p896_p13 = pneg %p895_p12 }
  0x1a   : > { %p902_p4 = por %p901_p3, %p900_p2 }
  0x1c   : > { %p903_p5 = pnand %p902_p4, %p896_p13 }
  0x1e   : > { %906 = shalt.err (!%p903_p5)
}
  0x1f   : > { %s907_s17 = scalar_lea.vmem %s1134_s29, 1024  ;;  %s1038_s18 = smov [#allocation3]  }
  0x20   : > { %p908_p6 = scmp.ne.s32.totalorder %s1134_s29, %s907_s17  ;;  %s912_s19 = sshll.u32 %s1038_s18, 4  ;;  %s913_s19 = int_to_ptr.vmem [resolvable:$false] %s912_s19 }
  0x21   : > { %s914_s25 = scalar_lea.vmem %s913_s19, 2048  ;;  %p915_p12 = scmp.lt.s32.totalorder %s1134_s29, %s913_s19 }
  0x22   : > { %p910_p8 = pnand %p908_p6, %p894_p11  ;;  %p916_p0 = scmp.lt.s32.totalorder %s914_s25, %s907_s17 }
  0x24   : > { %p911_p10 = pneg %p910_p8  ;;  %p917_p1 = por %p916_p0, %p915_p12 }
  0x26   : > { %p918_p2 = pnand %p917_p1, %p911_p10 }
  0x28   : > { %921 = shalt.err (!%p918_p2)
}
  0x29   : > { %s1039_s26 = smov 64   ;;  %s1040_s28 = smov 4  }
  0x2a   : > { %815 = dma.hbm_to_vmem [thread:$0]  (!%p1130_p9), %s1124_s27, 1024, %s1134_s29, %s152_s3, %s1039_s26, %s1039_s26, %s1040_s28  }
  0x2b   : > { %p711_p13 = scmp.ge.s32.totalorder %s1036_s14, 1  ;;  %p197_p3 = scmp.lt.s32.totalorder %s1036_s14, 3 }
  0x2c   : > { %s1178_s7 = scalar_lea.hbm %s1295_s1, %s736_s23  ;;  %s179_s8 = scalar_lea.vmem [#allocation6], %s705_s24 }
  0x2d   : > { %p1169_p4 = pnand %p711_p13, %p197_p3  ;;  %s189_s9 = sshll.u32 %s179_s8, 4  ;;  %s1182_s9 = int_to_ptr.vmem [resolvable:$true] %s189_s9 }
  0x2e   : > { %s176_s27 = scalar_lea.sflag [#allocation7], %s1115_s22  ;;  %s922_s29 = scalar_lea.hbm %s1178_s7, 1024 }
  0x2f   : > { %p923_p5 = scmp.ne.s32.totalorder %s1178_s7, %s922_s29  ;;  %s927_s23 = scalar_lea.hbm %s1295_s1, 2048 }
  0x30   : > { %p928_p10 = scmp.lt.u32.totalorder %s1178_s7, %s1295_s1  ;;  %p929_p12 = scmp.lt.u32.totalorder %s927_s23, %s922_s29 }
  0x31   : > { %p925_p6 = pnand %p923_p5, %p894_p11  ;;  %p931_p1 = scmp.lt.u32.totalorder %s922_s29, %s1178_s7 }
  0x32   : > { %p930_p0 = por %p929_p12, %p928_p10 }
  0x33   : > { %p926_p8 = pneg %p925_p6 }
  0x34   : > { %p932_p2 = por %p931_p1, %p930_p0 }
  0x36   : > { %p933_p13 = pnand %p932_p2, %p926_p8 }
  0x38   : > { %936 = shalt.err (!%p933_p13)
}
  0x39   : > { %s937_s24 = scalar_lea.vmem %s1182_s9, 1024  ;;  %s1041_s25 = smov [#allocation6]  }
  0x3a   : > { %p938_p3 = scmp.ne.s32.totalorder %s1182_s9, %s937_s24  ;;  %s942_s5 = sshll.u32 %s1041_s25, 4  ;;  %s943_s5 = int_to_ptr.vmem [resolvable:$false] %s942_s5 }
  0x3b   : > { %s944_s6 = scalar_lea.vmem %s943_s5, 2048  ;;  %p945_p7 = scmp.lt.s32.totalorder %s1182_s9, %s943_s5 }
  0x3c   : > { %p940_p5 = pnand %p938_p3, %p894_p11  ;;  %p946_p10 = scmp.lt.s32.totalorder %s944_s6, %s937_s24 }
  0x3e   : > { %p941_p6 = pneg %p940_p5  ;;  %p947_p12 = por %p946_p10, %p945_p7 }
  0x40   : > { %p948_p0 = pnand %p947_p12, %p941_p6 }
  0x42   : > { %951 = shalt.err (!%p948_p0)
}
  0x43   : > { %818 = dma.hbm_to_vmem [thread:$0]  (!%p1130_p9), %s1178_s7, 1024, %s1182_s9, %s176_s27, %s1039_s26, %s1039_s26, %s1040_s28  }
  0x44   : > { %201 = sbr.rel (%p1169_p4) target bundleno = 384 (0x180), region = 28  ;;  %s203_s8 = sand.u32 (!%p1169_p4), 1, %s1020_s10  }
  0x45   : > { %s712_s29 = sshll.u32 (!%p1169_p4), %s203_s8, 6  ;;  %s204_s3 = scalar_lea.sflag (!%p1169_p4), [#allocation4], %s203_s8 }
  0x46   : > { %s1216_s17 = scalar_lea.vmem (!%p1169_p4), [#allocation3], %s712_s29  ;;  %p1302_p7 = scmp.ne.s32.totalorder (!%p1169_p4), %s1299_s20, 0 }
  0x4b   : > { %1003 = dma.done.wait (%p1302_p7), %s204_s3, 1024  }
  0x4c   : > { %1005 = vsyncadd (%p1302_p7), %s204_s3, 4294966272  ;;  %s213_s22 = scalar_lea.sflag [#allocation7], %s203_s8  ;;  %s1222_s30 = scalar_lea.vmem [#allocation6], %s712_s29 }
  0x4d   : > { %1007 = dma.done.wait (%p1302_p7), %s213_s22, 1024  }
  0x4e   : > { %1009 = vsyncadd (%p1302_p7), %s213_s22, 4294966272  ;;  %p241_p9 = scmp.eq.s32.totalorder %s1028_s12, 0 }
  0x4f   : > { %v1042_v0 = vmov (%p241_p9), 0.0  }
  0x50   : > { %246 = sbr.rel (!%p241_p9) target bundleno = 88 (0x58), region = 40  ;;  %247 = vst [vmem:[#allocation2] sm:$0xff] (%p241_p9), %v1042_v0  ;;  %248 = vst [vmem:[#allocation2 + $0x8] sm:$0xff] (%p241_p9), %v1042_v0 }
  0x51   : > { %249 = vst [vmem:[#allocation2 + $0x10] sm:$0xff] (%p241_p9), %v1042_v0  ;;  %250 = vst [vmem:[#allocation2 + $0x18] sm:$0xff] (%p241_p9), %v1042_v0 }
  0x52   : > { %251 = vst [vmem:[#allocation2 + $0x20] sm:$0xff] (%p241_p9), %v1042_v0  ;;  %252 = vst [vmem:[#allocation2 + $0x28] sm:$0xff] (%p241_p9), %v1042_v0 }
  0x53   : > { %253 = vst [vmem:[#allocation2 + $0x30] sm:$0xff] (%p241_p9), %v1042_v0  ;;  %254 = vst [vmem:[#allocation2 + $0x38] sm:$0xff] (%p241_p9), %v1042_v0 }
  0x54   : > { %255 = vst [vmem:[#allocation2 + $0x40] sm:$0xff] (%p241_p9), %v1042_v0  ;;  %256 = vst [vmem:[#allocation2 + $0x48] sm:$0xff] (%p241_p9), %v1042_v0 }
  0x55   : > { %257 = vst [vmem:[#allocation2 + $0x50] sm:$0xff] (%p241_p9), %v1042_v0  ;;  %258 = vst [vmem:[#allocation2 + $0x58] sm:$0xff] (%p241_p9), %v1042_v0 }
  0x56   : > { %259 = vst [vmem:[#allocation2 + $0x60] sm:$0xff] (%p241_p9), %v1042_v0  ;;  %260 = vst [vmem:[#allocation2 + $0x68] sm:$0xff] (%p241_p9), %v1042_v0 }
  0x57   : > { %261 = vst [vmem:[#allocation2 + $0x70] sm:$0xff] %v1042_v0  ;;  %262 = vst [vmem:[#allocation2 + $0x78] sm:$0xff] %v1042_v0 }
  0x58 PF: > { %v876_v1 = vld [vmem:[%s1222_s30] sm:$0xff]   ;;  %v877_v2 = vld [vmem:[%s1222_s30 + $0x8] sm:$0xff]   ;;  %v878_v3 = vld [vmem:[%s1222_s30 + $0x10] sm:$0xff]   ;;  %p536_p11 = scmp.eq.s32.totalorder %s1028_s12, 1 }
  0x59   : > { %756 = vmatprep.subr.bf16.mxu0 %v876_v1  ;;  %788 = vmatprep.subr.bf16.mxu1 %v876_v1  ;;  %v879_v4 = vld [vmem:[%s1222_s30 + $0x18] sm:$0xff]   ;;  %v884_v5 = vld [vmem:[%s1216_s17] sm:$0xff]   ;;  %v881_v8 = vld [vmem:[%s1222_s30 + $0x28] sm:$0xff]  }
  0x5a   : > { %757 = vmatpush3.bf16.msra.mxu0 %v876_v1  ;;  %796 = vmatpush3.bf16.msra.mxu1 %v876_v1  ;;  %v885_v6 = vld [vmem:[%s1216_s17 + $0x20] sm:$0xff]   ;;  %v882_v9 = vld [vmem:[%s1222_s30 + $0x30] sm:$0xff]   ;;  %v883_v10 = vld [vmem:[%s1222_s30 + $0x38] sm:$0xff]  }
  0x5b   : > { %758 = vmatprep.subr.bf16.mxu0 %v877_v2  ;;  %789 = vmatprep.subr.bf16.mxu1 %v877_v2  ;;  %v880_v7 = vld [vmem:[%s1222_s30 + $0x20] sm:$0xff]   ;;  %v886_v11 = vld [vmem:[%s1216_s17 + $0x8] sm:$0xff]   ;;  %v888_v13 = vld [vmem:[%s1216_s17 + $0x10] sm:$0xff]  }
  0x5c   : > { %772 = vmatprep.mubr.bf16.mxu0 %v884_v5  ;;  %780 = vmatprep.mubr.bf16.mxu1 %v885_v6  ;;  %v887_v12 = vld [vmem:[%s1216_s17 + $0x28] sm:$0xff]   ;;  %v889_v14 = vld [vmem:[%s1216_s17 + $0x30] sm:$0xff]   ;;  %v890_v15 = vld [vmem:[%s1216_s17 + $0x18] sm:$0xff]  }
  0x5d   : > { %v891_v16 = vld [vmem:[%s1216_s17 + $0x38] sm:$0xff]   ;;  %v265_v17 = vld [vmem:[#allocation2 + $0x10] sm:$0xff]  ;;  %v263_v19 = vld [vmem:[#allocation2] sm:$0xff] }
  0x5e   : > { %759 = vmatpush3.bf16.msra.mxu0 %v877_v2  ;;  %797 = vmatpush3.bf16.msra.mxu1 %v877_v2  ;;  %v273_v18 = vld [vmem:[#allocation2 + $0x50] sm:$0xff]  ;;  %v271_v20 = vld [vmem:[#allocation2 + $0x40] sm:$0xff]  ;;  %v266_v23 = vld [vmem:[#allocation2 + $0x18] sm:$0xff] }
  0x5f   : > { %760 = vmatprep.subr.bf16.mxu0 %v878_v3  ;;  %790 = vmatprep.subr.bf16.mxu1 %v878_v3  ;;  %v274_v24 = vld [vmem:[#allocation2 + $0x58] sm:$0xff]  ;;  %v264_v29 = vld [vmem:[#allocation2 + $0x8] sm:$0xff]  ;;  %v269_v41 = vld [vmem:[#allocation2 + $0x30] sm:$0xff] }
  0x60   : > { %v272_v30 = vld [vmem:[#allocation2 + $0x48] sm:$0xff]  ;;  %v277_v42 = vld [vmem:[#allocation2 + $0x70] sm:$0xff]  ;;  %v267_v43 = vld [vmem:[#allocation2 + $0x20] sm:$0xff] }
  0x61   : > { %v275_v44 = vld [vmem:[#allocation2 + $0x60] sm:$0xff]  ;;  %v270_v47 = vld [vmem:[#allocation2 + $0x38] sm:$0xff]  ;;  %v268_v53 = vld [vmem:[#allocation2 + $0x28] sm:$0xff] }
  0x62   : > { %761 = vmatpush3.bf16.msra.mxu0 %v878_v3  ;;  %798 = vmatpush3.bf16.msra.mxu1 %v878_v3  ;;  %v278_v48 = vld [vmem:[#allocation2 + $0x78] sm:$0xff]  ;;  %v276_v54 = vld [vmem:[#allocation2 + $0x68] sm:$0xff] }
  0x63   : > { %762 = vmatprep.subr.bf16.mxu0 %v879_v4  ;;  %791 = vmatprep.subr.bf16.mxu1 %v879_v4 }
  0x66   : > { %763 = vmatpush3.bf16.msra.mxu0 %v879_v4  ;;  %799 = vmatpush3.bf16.msra.mxu1 %v879_v4 }
  0x67   : > { %764 = vmatprep.subr.bf16.mxu0 %v880_v7  ;;  %792 = vmatprep.subr.bf16.mxu1 %v880_v7 }
  0x6a   : > { %765 = vmatpush3.bf16.msra.mxu0 %v880_v7  ;;  %800 = vmatpush3.bf16.msra.mxu1 %v880_v7 }
  0x6b   : > { %766 = vmatprep.subr.bf16.mxu0 %v881_v8  ;;  %793 = vmatprep.subr.bf16.mxu1 %v881_v8 }
  0x6e   : > { %767 = vmatpush3.bf16.msra.mxu0 %v881_v8  ;;  %801 = vmatpush3.bf16.msra.mxu1 %v881_v8 }
  0x6f   : > { %768 = vmatprep.subr.bf16.mxu0 %v882_v9  ;;  %794 = vmatprep.subr.bf16.mxu1 %v882_v9 }
  0x72   : > { %769 = vmatpush3.bf16.msra.mxu0 %v882_v9  ;;  %802 = vmatpush3.bf16.msra.mxu1 %v882_v9 }
  0x73   : > { %770 = vmatprep.subr.bf16.mxu0 %v883_v10  ;;  %795 = vmatprep.subr.bf16.mxu1 %v883_v10 }
  0x76   : > { %771 = vmatpush3.bf16.msra.mxu0 %v883_v10  ;;  %803 = vmatpush3.bf16.msra.mxu1 %v883_v10 }
  0x79   : > { %773 = vmatmul.mubr.bf16.vlgmr.msra.gmra.mrb[0].mxu0 %v886_v11  ;;  %781 = vmatmul.mubr.bf16.vlgmr.msra.gmra.mrb[0].mxu1 %v887_v12 }
  0x7a   : > { %776 = vmatprep.mubr.bf16.mxu0 %v888_v13  ;;  %784 = vmatprep.mubr.bf16.mxu1 %v889_v14 }
  0x81   : > { %777 = vmatmul.mubr.bf16.gmra.mrb[4].mxu0 %v890_v15  ;;  %785 = vmatmul.mubr.bf16.gmra.mrb[4].mxu1 %v891_v16 }
 0x14c   : > { %v774_v21 = vpop.f32.mrb[0].mxu0  ;;  %v782_v22 = vpop.f32.mrb[0].mxu1 }
 0x14d   : > { %v506_v25 = vadd.f32 %v774_v21, %v265_v17  ;;  %v514_v26 = vadd.f32 %v782_v22, %v273_v18  ;;  %v441_v27 = vpop.f32.mrb[1].mxu0  ;;  %v473_v28 = vpop.f32.mrb[1].mxu1 }
 0x14e   : > { %v504_v31 = vadd.f32 %v441_v27, %v263_v19  ;;  %v512_v32 = vadd.f32 %v473_v28, %v271_v20  ;;  %v775_v33 = vpop.f32.mrb[2].mxu0  ;;  %v783_v34 = vpop.f32.mrb[2].mxu1 }
 0x14f   : > { %522 = vst [vmem:[#allocation2 + $0x10] sm:$0xff] %v506_v25  ;;  %530 = vst [vmem:[#allocation2 + $0x50] sm:$0xff] %v514_v26  ;;  %v507_v35 = vadd.f32 %v775_v33, %v266_v23  ;;  %v515_v36 = vadd.f32 %v783_v34, %v274_v24  ;;  %v444_v37 = vpop.f32.mrb[3].mxu0  ;;  %v476_v38 = vpop.f32.mrb[3].mxu1 }
 0x150   : > { %520 = vst [vmem:[#allocation2] sm:$0xff] %v504_v31  ;;  %528 = vst [vmem:[#allocation2 + $0x40] sm:$0xff] %v512_v32  ;;  %v505_v39 = vadd.f32 %v444_v37, %v264_v29  ;;  %v513_v40 = vadd.f32 %v476_v38, %v272_v30 }
 0x151   : > { %523 = vst [vmem:[#allocation2 + $0x18] sm:$0xff] %v507_v35  ;;  %531 = vst [vmem:[#allocation2 + $0x58] sm:$0xff] %v515_v36 }
 0x152   : > { %521 = vst [vmem:[#allocation2 + $0x8] sm:$0xff] %v505_v39  ;;  %529 = vst [vmem:[#allocation2 + $0x48] sm:$0xff] %v513_v40 }
 0x154   : > { %v778_v45 = vpop.f32.mrb[4].mxu0  ;;  %v786_v46 = vpop.f32.mrb[4].mxu1  ;;  %540 = sbr.rel (!%p536_p11) target bundleno = 358 (0x166), region = 44 }
 0x155   : > { %v510_v49 = vadd.f32 %v778_v45, %v269_v41  ;;  %v518_v50 = vadd.f32 %v786_v46, %v277_v42  ;;  %v457_v51 = vpop.f32.mrb[5].mxu0  ;;  %v489_v52 = vpop.f32.mrb[5].mxu1 }
 0x156   : > { %v508_v55 = vadd.f32 %v457_v51, %v267_v43  ;;  %v516_v56 = vadd.f32 %v489_v52, %v275_v44  ;;  %v779_v57 = vpop.f32.mrb[6].mxu0  ;;  %v787_v58 = vpop.f32.mrb[6].mxu1  ;;  %v543_v3 = vld [vmem:[#allocation2 + $0x10] sm:$0xff] (%p536_p11) }
 0x157   : > { %526 = vst [vmem:[#allocation2 + $0x30] sm:$0xff] %v510_v49  ;;  %534 = vst [vmem:[#allocation2 + $0x70] sm:$0xff] %v518_v50  ;;  %v511_v59 = vadd.f32 %v779_v57, %v270_v47  ;;  %v519_v60 = vadd.f32 %v787_v58, %v278_v48  ;;  %v460_v61 = vpop.f32.mrb[7].mxu0  ;;  %v492_v62 = vpop.f32.mrb[7].mxu1  ;;  %v541_v1 = vld [vmem:[#allocation2] sm:$0xff] (%p536_p11)  ;;  %v559_v6 = vmax.f32 (%p536_p11), %v543_v3, 0.0 }
 0x158   : > { %524 = vst [vmem:[#allocation2 + $0x20] sm:$0xff] %v508_v55  ;;  %532 = vst [vmem:[#allocation2 + $0x60] sm:$0xff] %v516_v56  ;;  %v509_v63 = vadd.f32 %v460_v61, %v268_v53  ;;  %v517_v0 = vadd.f32 %v492_v62, %v276_v54  ;;  %v557_v4 = vmax.f32 (%p536_p11), %v541_v1, 0.0  ;;  %v544_v7 = vld [vmem:[#allocation2 + $0x18] sm:$0xff] (%p536_p11)  ;;  %v549_v15 = vld [vmem:[#allocation2 + $0x40] sm:$0xff] (%p536_p11) }
 0x159   : > { %527 = vst [vmem:[#allocation2 + $0x38] sm:$0xff] %v511_v59  ;;  %535 = vst [vmem:[#allocation2 + $0x78] sm:$0xff] %v519_v60  ;;  %v542_v2 = vld [vmem:[#allocation2 + $0x8] sm:$0xff] (%p536_p11)  ;;  %v560_v10 = vmax.f32 (%p536_p11), %v544_v7, 0.0  ;;  %v565_v18 = vmax.f32 (%p536_p11), %v549_v15, 0.0  ;;  %v551_v20 = vld [vmem:[#allocation2 + $0x50] sm:$0xff] (%p536_p11) }
 0x15a   : > { %525 = vst [vmem:[#allocation2 + $0x28] sm:$0xff] %v509_v63  ;;  %533 = vst [vmem:[#allocation2 + $0x68] sm:$0xff] %v517_v0  ;;  %v558_v5 = vmax.f32 (%p536_p11), %v542_v2, 0.0  ;;  %v550_v19 = vld [vmem:[#allocation2 + $0x48] sm:$0xff] (%p536_p11)  ;;  %v552_v21 = vld [vmem:[#allocation2 + $0x58] sm:$0xff] (%p536_p11)  ;;  %v567_v23 = vmax.f32 (%p536_p11), %v551_v20, 0.0 }
 0x15b   : > { %573 = vst [vmem:[#allocation8] sm:$0xff] %v557_v4  ;;  %575 = vst [vmem:[#allocation8 + $0x10] sm:$0xff] %v559_v6  ;;  %v566_v22 = vmax.f32 %v550_v19, 0.0  ;;  %v568_v24 = vmax.f32 %v552_v21, 0.0 }
 0x15c   : > { %574 = vst [vmem:[#allocation8 + $0x8] sm:$0xff] %v558_v5  ;;  %576 = vst [vmem:[#allocation8 + $0x18] sm:$0xff] %v560_v10 }
 0x15d   : > { %581 = vst [vmem:[#allocation8 + $0x40] sm:$0xff] %v565_v18  ;;  %582 = vst [vmem:[#allocation8 + $0x48] sm:$0xff] %v566_v22 }
 0x15e   : > { %v547_v13 = vld [vmem:[#allocation2 + $0x30] sm:$0xff]  ;;  %583 = vst [vmem:[#allocation8 + $0x50] sm:$0xff] %v567_v23  ;;  %584 = vst [vmem:[#allocation8 + $0x58] sm:$0xff] %v568_v24 }
 0x15f   : > { %v545_v8 = vld [vmem:[#allocation2 + $0x20] sm:$0xff]  ;;  %v563_v16 = vmax.f32 %v547_v13, 0.0  ;;  %v555_v27 = vld [vmem:[#allocation2 + $0x70] sm:$0xff] }
 0x160   : > { %v561_v11 = vmax.f32 %v545_v8, 0.0  ;;  %v548_v14 = vld [vmem:[#allocation2 + $0x38] sm:$0xff]  ;;  %v553_v25 = vld [vmem:[#allocation2 + $0x60] sm:$0xff]  ;;  %v571_v30 = vmax.f32 %v555_v27, 0.0 }
 0x161   : > { %v546_v9 = vld [vmem:[#allocation2 + $0x28] sm:$0xff]  ;;  %v564_v17 = vmax.f32 %v548_v14, 0.0  ;;  %579 = vst [vmem:[#allocation8 + $0x30] sm:$0xff] %v563_v16  ;;  %v569_v28 = vmax.f32 %v553_v25, 0.0  ;;  %v556_v31 = vld [vmem:[#allocation2 + $0x78] sm:$0xff] }
 0x162   : > { %v562_v12 = vmax.f32 %v546_v9, 0.0  ;;  %577 = vst [vmem:[#allocation8 + $0x20] sm:$0xff] %v561_v11  ;;  %v554_v26 = vld [vmem:[#allocation2 + $0x68] sm:$0xff]  ;;  %v572_v32 = vmax.f32 %v556_v31, 0.0  ;;  %587 = vst [vmem:[#allocation8 + $0x70] sm:$0xff] %v571_v30 }
 0x163   : > { %580 = vst [vmem:[#allocation8 + $0x38] sm:$0xff] %v564_v17  ;;  %v570_v29 = vmax.f32 %v554_v26, 0.0  ;;  %585 = vst [vmem:[#allocation8 + $0x60] sm:$0xff] %v569_v28 }
 0x164   : > { %578 = vst [vmem:[#allocation8 + $0x28] sm:$0xff] %v562_v12  ;;  %588 = vst [vmem:[#allocation8 + $0x78] sm:$0xff] %v572_v32 }
 0x165   : > { %586 = vst [vmem:[#allocation8 + $0x68] sm:$0xff] %v570_v29 }
 0x166 PF: > { %p1250_p4 = scmp.eq.s32.totalorder %s702_s15, 1  ;;  %s1043_s20 = smov [#allocation8]  }
 0x167   : > { %s599_s26 = sshll.u32 %s1043_s20, 4  ;;  %s600_s26 = int_to_ptr.vmem [resolvable:$true] %s599_s26 }
 0x168   : > { %s952_s28 = scalar_lea.vmem %s600_s26, 2048  ;;  %p959_p13 = scmp.lt.s32.totalorder %s600_s26, %s600_s26 }
 0x169   : > { %p953_p8 = scmp.ne.s32.totalorder %s600_s26, %s952_s28  ;;  %p960_p3 = scmp.lt.s32.totalorder %s952_s28, %s952_s28 }
 0x16b   : > { %p954_p1 = pnand %p953_p8, %p1250_p4  ;;  %p961_p5 = por %p960_p3, %p959_p13 }
 0x16d   : > { %p955_p2 = pneg %p954_p1 }
 0x16f   : > { %p962_p6 = pnand %p961_p5, %p955_p2 }
 0x171   : > { %965 = shalt.err (!%p962_p6)
}
 0x172   : > { %s966_s15 = scalar_lea.hbm %s1296_s2, 2048 }
 0x173   : > { %p967_p10 = scmp.ne.s32.totalorder %s1296_s2, %s966_s15  ;;  %p972_p7 = scmp.lt.u32.totalorder %s966_s15, %s1296_s2 }
 0x175   : > { %p968_p12 = pnand %p967_p10, %p1250_p4 }
 0x177   : > { %p969_p0 = pneg %p968_p12 }
 0x179   : > { %p974_p9 = pnand %p972_p7, %p969_p0 }
 0x17b   : > { %977 = shalt.err (!%p974_p9)
}
 0x17c   : > { %s1044_s19 = smov 128   ;;  %s1045_s24 = smov 8  }
 0x17d   : > { %809 = dma.vmem_to_hbm [thread:$0]  (%p1250_p4), %s600_s26, 2048, %s1296_s2, [#allocation5], %s1044_s19, %s1044_s19, %s1045_s24  }
 0x17e   : > { %1011 = dma.done.wait (%p1250_p4), [#allocation5], 2048  }
 0x17f   : > { %1013 = vsyncadd (%p1250_p4), [#allocation5], 4294965248 }
 0x180 PF: > { %s19_s14 = sadd.s32 1, %s1036_s14   ;;  %s1304_s9 = smov %s1020_s10 }
 0x181   : > { %p16_p11 = scmp.ge.s32.totalorder %s19_s14, 4   ;;  %s1305_s10 = smov %s1024_s11 }
 0x182   : > { %s1306_s11 = smov %s1112_s21  ;;  %s1307_s12 = smov %s1032_s13 }
 0x183   : > { %s1308_s13 = smov %s1310_s16  ;;  %18 = sbr.rel (!%p16_p11) target bundleno = 7 (0x7), region = 87 }
 0x18a   :  { %615 = vsyncpa [#allocation4], 1 }
 0x18b   :  { %617 = vsyncpa [#allocation4 + $0x1], 1 }
 0x18c   :  { %618 = vsyncpa [#allocation7], 1 }
 0x18d   :  { %620 = vsyncpa [#allocation7 + $0x1], 1 }
 0x18e   :  { %621 = vsyncpa [#allocation5], 1 }
 0x18f   :  { %623 = vsyncpa [#allocation5 + $0x1], 1 }

</bundles_post_ra>
